<compile_context>
chip_gen: v7x
topology: tpu7x:2x2x1
jax: 0.10.0
libtpu: 0.0.40
codegen_flags: <defaults>
</compile_context>

<pallas_src>
import functools

import jax
import jax.numpy as jnp
from jax.experimental import pallas as pl
from jax.experimental.pallas import tpu as pltpu


def _fit(dim, target):
    """Largest usable tile: `target` if it divides `dim`, else the full dim."""
    if dim <= target or dim % target != 0:
        return dim
    return target


# ---------------------------------------------------------------------------
# Tiled linear: y = x @ w + b (+ optional activation epilogue)
# ---------------------------------------------------------------------------

def _linear_kernel(x_ref, w_ref, b_ref, o_ref, acc_ref, *, activation):
    @pl.when(pl.program_id(2) == 0)
    def _():
        acc_ref[...] = jnp.zeros_like(acc_ref)

    acc_ref[...] += jnp.dot(x_ref[...], w_ref[...],
                            preferred_element_type=jnp.float32)

    @pl.when(pl.program_id(2) == pl.num_programs(2) - 1)
    def _():
        y = acc_ref[...] + b_ref[...]                      # f32 epilogue
        if activation == "gelu":
            # TODO(synk): tanh-approx GELU; HF phobert default is exact erf GELU.
            y = 0.5 * y * (1.0 + jnp.tanh(0.7978845608028654 *
                                          (y + 0.044715 * y * y * y)))
        elif activation == "tanh":
            y = jnp.tanh(y)
        o_ref[...] = y.astype(o_ref.dtype)


def linear(x, w, b, activation=None, *, tm=256, tn=512, tk=256,
           out_dtype=jnp.bfloat16):
    M, K = x.shape
    N = w.shape[1]
    tm, tn, tk = _fit(M, tm), _fit(N, tn), _fit(K, tk)
    kernel = functools.partial(_linear_kernel, activation=activation)
    return pl.pallas_call(
        kernel,
        out_shape=jax.ShapeDtypeStruct((M, N), out_dtype),
        grid_spec=pltpu.PrefetchScalarGridSpec(
            num_scalar_prefetch=0,
            grid=(M // tm, N // tn, K // tk),
            in_specs=[
                pl.BlockSpec((tm, tk), lambda i, j, k: (i, k)),
                pl.BlockSpec((tk, tn), lambda i, j, k: (k, j)),
                pl.BlockSpec((1, tn), lambda i, j, k: (0, j)),
            ],
            out_specs=pl.BlockSpec((tm, tn), lambda i, j, k: (i, j)),
            scratch_shapes=[pltpu.VMEM((tm, tn), jnp.float32)]),
        compiler_params=pltpu.CompilerParams(
            dimension_semantics=("parallel", "parallel", "arbitrary")),
    )(x, w, b.reshape(1, N).astype(jnp.float32))


# ---------------------------------------------------------------------------
# Tiled linear fused with (bias + residual add + LayerNorm) epilogue.
# Output width N is kept whole per tile (LayerNorm needs the full hidden dim).
# ---------------------------------------------------------------------------

def _linear_res_ln_kernel(x_ref, w_ref, b_ref, r_ref, g_ref, be_ref,
                          o_ref, acc_ref, *, eps):
    @pl.when(pl.program_id(1) == 0)
    def _():
        acc_ref[...] = jnp.zeros_like(acc_ref)

    acc_ref[...] += jnp.dot(x_ref[...], w_ref[...],
                            preferred_element_type=jnp.float32)

    @pl.when(pl.program_id(1) == pl.num_programs(1) - 1)
    def _():
        y = acc_ref[...] + b_ref[...] + r_ref[...].astype(jnp.float32)
        mu = jnp.mean(y, axis=-1, keepdims=True)
        var = jnp.mean(jnp.square(y - mu), axis=-1, keepdims=True)
        yn = (y - mu) * jax.lax.rsqrt(var + eps)
        o_ref[...] = (yn * g_ref[...] + be_ref[...]).astype(o_ref.dtype)


def linear_residual_layernorm(x, w, b, residual, gamma, beta, *, eps=1e-12,
                              tm=256, tk=256, out_dtype=jnp.bfloat16):
    """LayerNorm(residual + x @ w + b), fused into one kernel."""
    M, K = x.shape
    N = w.shape[1]
    tm, tk = _fit(M, tm), _fit(K, tk)
    kernel = functools.partial(_linear_res_ln_kernel, eps=eps)
    return pl.pallas_call(
        kernel,
        out_shape=jax.ShapeDtypeStruct((M, N), out_dtype),
        grid_spec=pltpu.PrefetchScalarGridSpec(
            num_scalar_prefetch=0,
            grid=(M // tm, K // tk),
            in_specs=[
                pl.BlockSpec((tm, tk), lambda i, k: (i, k)),
                pl.BlockSpec((tk, N), lambda i, k: (k, 0)),
                pl.BlockSpec((1, N), lambda i, k: (0, 0)),
                pl.BlockSpec((tm, N), lambda i, k: (i, 0)),   # residual
                pl.BlockSpec((1, N), lambda i, k: (0, 0)),    # gamma
                pl.BlockSpec((1, N), lambda i, k: (0, 0)),    # beta
            ],
            out_specs=pl.BlockSpec((tm, N), lambda i, k: (i, 0)),
            scratch_shapes=[pltpu.VMEM((tm, N), jnp.float32)]),
        compiler_params=pltpu.CompilerParams(
            dimension_semantics=("parallel", "arbitrary")),
    )(x, w, b.reshape(1, N).astype(jnp.float32), residual,
      gamma.reshape(1, N), beta.reshape(1, N))


# ---------------------------------------------------------------------------
# Standalone LayerNorm (embedding LN), tiled over rows.
# ---------------------------------------------------------------------------

def _ln_kernel(x_ref, g_ref, b_ref, o_ref, *, eps):
    x = x_ref[...].astype(jnp.float32)
    mu = jnp.mean(x, axis=-1, keepdims=True)
    var = jnp.mean(jnp.square(x - mu), axis=-1, keepdims=True)
    y = (x - mu) * jax.lax.rsqrt(var + eps)
    o_ref[...] = (y * g_ref[...] + b_ref[...]).astype(o_ref.dtype)


def layernorm(x, gamma, beta, *, eps=1e-12, tm=256, out_dtype=jnp.bfloat16):
    M, H = x.shape
    tm = _fit(M, tm)
    kernel = functools.partial(_ln_kernel, eps=eps)
    return pl.pallas_call(
        kernel,
        out_shape=jax.ShapeDtypeStruct((M, H), out_dtype),
        grid_spec=pltpu.PrefetchScalarGridSpec(
            num_scalar_prefetch=0,
            grid=(M // tm,),
            in_specs=[pl.BlockSpec((tm, H), lambda i: (i, 0)),
                      pl.BlockSpec((1, H), lambda i: (0, 0)),
                      pl.BlockSpec((1, H), lambda i: (0, 0))],
            out_specs=pl.BlockSpec((tm, H), lambda i: (i, 0))),
        compiler_params=pltpu.CompilerParams(dimension_semantics=("parallel",)),
    )(x, gamma.reshape(1, H), beta.reshape(1, H))


# ---------------------------------------------------------------------------
# Flash-style attention: online softmax over kv tiles, O(tq*D) state in VMEM.
# q,k,v: [B*heads, S, head_dim] (bf16); mask_bias: [B*heads, 1, S] additive (f32).
# ---------------------------------------------------------------------------

def _flash_kernel(q_ref, k_ref, v_ref, bias_ref, o_ref, m_sc, l_sc, acc_sc,
                  *, scale):
    ki = pl.program_id(2)

    @pl.when(ki == 0)
    def _():
        m_sc[...] = jnp.full_like(m_sc, -1e30)
        l_sc[...] = jnp.zeros_like(l_sc)
        acc_sc[...] = jnp.zeros_like(acc_sc)

    q = q_ref[0]                                   # [tq, D] bf16
    k = k_ref[0]                                   # [tk, D] bf16
    v = v_ref[0]                                   # [tk, D] bf16

    s = jax.lax.dot_general(q, k, (((1,), (1,)), ((), ())),
                            preferred_element_type=jnp.float32) * scale
    s = s + bias_ref[0]                            # precomputed additive mask

    m_prev = m_sc[...]
    m_new = jnp.maximum(m_prev, jnp.max(s, axis=-1, keepdims=True))
    alpha = jnp.exp(m_prev - m_new)
    p = jnp.exp(s - m_new)
    l_sc[...] = alpha * l_sc[...] + jnp.sum(p, axis=-1, keepdims=True)
    acc_sc[...] = alpha * acc_sc[...] + jax.lax.dot_general(
        p.astype(v.dtype), v, (((1,), (0,)), ((), ())),
        preferred_element_type=jnp.float32)
    m_sc[...] = m_new

    @pl.when(ki == pl.num_programs(2) - 1)
    def _():
        inv_l = pl.reciprocal(l_sc[...], approx=True)
        o_ref[0] = (acc_sc[...] * inv_l).astype(o_ref.dtype)


def flash_attention(q, k, v, mask_bias, scale, *, tq=128, tk=128,
                    out_dtype=jnp.bfloat16):
    BH, S, D = q.shape
    tq, tk = _fit(S, tq), _fit(S, tk)
    kernel = functools.partial(_flash_kernel, scale=scale)
    return pl.pallas_call(
        kernel,
        out_shape=jax.ShapeDtypeStruct((BH, S, D), out_dtype),
        grid_spec=pltpu.PrefetchScalarGridSpec(
            num_scalar_prefetch=0,
            grid=(BH, S // tq, S // tk),
            in_specs=[
                pl.BlockSpec((1, tq, D), lambda b, qi, ki: (b, qi, 0)),
                pl.BlockSpec((1, tk, D), lambda b, qi, ki: (b, ki, 0)),
                pl.BlockSpec((1, tk, D), lambda b, qi, ki: (b, ki, 0)),
                pl.BlockSpec((1, 1, tk), lambda b, qi, ki: (b, 0, ki)),
            ],
            out_specs=pl.BlockSpec((1, tq, D), lambda b, qi, ki: (b, qi, 0)),
            scratch_shapes=[pltpu.VMEM((tq, 1), jnp.float32),
                            pltpu.VMEM((tq, 1), jnp.float32),
                            pltpu.VMEM((tq, D), jnp.float32)]),
        compiler_params=pltpu.CompilerParams(
            dimension_semantics=("parallel", "parallel", "arbitrary")),
    )(q, k, v, mask_bias)


# ---------------------------------------------------------------------------
# Pooler (dense + tanh) + dropout(eval=id) + classification head, one tiny kernel.
# ---------------------------------------------------------------------------

def _pool_fc_kernel(cls_ref, pw_ref, pb_ref, fw_ref, fb_ref, o_ref):
    h = jnp.dot(cls_ref[...], pw_ref[...],
                preferred_element_type=jnp.float32) + pb_ref[...]
    pooled = jnp.tanh(h)
    # nn.Dropout(p=0.3): identity in eval mode.
    logits = jnp.dot(pooled.astype(fw_ref.dtype), fw_ref[...],
                     preferred_element_type=jnp.float32) + fb_ref[...]
    o_ref[...] = logits


def pooler_fc(cls, pool_w, pool_b, fc_w, fc_b):
    B, H = cls.shape
    C = fc_w.shape[1]
    return pl.pallas_call(
        _pool_fc_kernel,
        out_shape=jax.ShapeDtypeStruct((B, C), jnp.float32),
        grid=(1,),
        in_specs=[pl.BlockSpec((B, H), lambda i: (0, 0)),
                  pl.BlockSpec((H, H), lambda i: (0, 0)),
                  pl.BlockSpec((1, H), lambda i: (0, 0)),
                  pl.BlockSpec((H, C), lambda i: (0, 0)),
                  pl.BlockSpec((1, C), lambda i: (0, 0))],
        out_specs=pl.BlockSpec((B, C), lambda i: (0, 0)),
    )(cls, pool_w, pool_b.reshape(1, H), fc_w, fc_b.reshape(1, C))


# ---------------------------------------------------------------------------
# Deterministic parameter construction (synthetic "phobert-base"-shaped, small).
# Weights are bf16 (MXU operands); biases / LN params / embeddings are f32.
# ---------------------------------------------------------------------------

def init_params(key, *, vocab, max_pos, type_vocab, hidden, n_heads, n_layers,
                ffn, n_classes):
    keys = iter(jax.random.split(key, 8 + 8 * n_layers))
    bf16 = jnp.bfloat16

    def nrm(shape, std=0.02, dtype=jnp.float32):
        return (jax.random.normal(next(keys), shape, jnp.float32) * std).astype(dtype)

    params = dict(
        n_heads=n_heads,
        word_emb=nrm((vocab, hidden)),
        pos_emb=nrm((max_pos, hidden)),
        type_emb=nrm((type_vocab, hidden)),
        emb_ln_g=jnp.ones((hidden,), jnp.float32),
        emb_ln_b=jnp.zeros((hidden,), jnp.float32),
        layers=[],
        pool_w=nrm((hidden, hidden), dtype=bf16),
        pool_b=jnp.zeros((hidden,), jnp.float32),
        # fc: nn.init.normal_(weight, std=0.02); nn.init.normal_(bias, 0) -> N(0,1)
        fc_w=nrm((hidden, n_classes), std=0.02, dtype=bf16),
        fc_b=jax.random.normal(next(keys), (n_classes,), jnp.float32),
    )
    for _ in range(n_layers):
        layer = dict(
            wqkv=nrm((hidden, 3 * hidden), dtype=bf16),     # fused Q|K|V
            bqkv=jnp.zeros((3 * hidden,), jnp.float32),
            wo=nrm((hidden, hidden), dtype=bf16),
            bo=jnp.zeros((hidden,), jnp.float32),
            ln1_g=jnp.ones((hidden,), jnp.float32),
            ln1_b=jnp.zeros((hidden,), jnp.float32),
            w1=nrm((hidden, ffn), dtype=bf16),
            b1=jnp.zeros((ffn,), jnp.float32),
            w2=nrm((ffn, hidden), dtype=bf16),
            b2=jnp.zeros((hidden,), jnp.float32),
            ln2_g=jnp.ones((hidden,), jnp.float32),
            ln2_b=jnp.zeros((hidden,), jnp.float32),
        )
        params["layers"].append(layer)
    return params


# ---------------------------------------------------------------------------
# Forward pass: BERT encoder -> pooler(tanh) -> dropout(eval=id) -> fc
# ---------------------------------------------------------------------------

def sentiment_classifier_forward(params, input_ids, attention_mask):
    B, S = input_ids.shape
    H = params["word_emb"].shape[1]
    nh = params["n_heads"]
    dh = H // nh

    # Embeddings (gather is XLA glue; normalization runs in the Pallas LN kernel).
    # TODO(synk): real roberta/phobert offsets positions by padding_idx+1; synthetic here.
    x = (params["word_emb"][input_ids]
         + params["pos_emb"][jnp.arange(S)][None, :, :]
         + params["type_emb"][0][None, None, :])                     # [B, S, H] f32
    x = layernorm(x.reshape(B * S, H), params["emb_ln_g"], params["emb_ln_b"])

    # Additive key-padding mask, precomputed once per forward: [B*nh, 1, S] f32.
    # (-1e9, not -inf: a fully-padded row would produce garbage but no NaNs.)
    mask_bias = (1.0 - attention_mask.astype(jnp.float32)) * (-1e9)
    mask_bias = jnp.broadcast_to(mask_bias[:, None, None, :], (B, nh, 1, S))
    mask_bias = mask_bias.reshape(B * nh, 1, S)

    scale = 1.0 / float(dh) ** 0.5

    for layer in params["layers"]:
        # Fused QKV projection: one matmul, one load of x for 3x the MXU work.
        qkv = linear(x, layer["wqkv"], layer["bqkv"])                # [B*S, 3H] bf16
        qkv = qkv.reshape(B, S, 3, nh, dh).transpose(2, 0, 3, 1, 4)  # [3,B,nh,S,dh]
        q = qkv[0].reshape(B * nh, S, dh)
        k = qkv[1].reshape(B * nh, S, dh)
        v = qkv[2].reshape(B * nh, S, dh)

        ctx = flash_attention(q, k, v, mask_bias, scale)             # [B*nh, S, dh]
        ctx = ctx.reshape(B, nh, S, dh).transpose(0, 2, 1, 3).reshape(B * S, H)

        # Attention output projection fused with residual-add + LayerNorm.
        x = linear_residual_layernorm(ctx, layer["wo"], layer["bo"],
                                      x, layer["ln1_g"], layer["ln1_b"])

        # FFN: matmul+bias+GELU fused; second matmul fused with residual + LN.
        ff = linear(x, layer["w1"], layer["b1"], activation="gelu")
        x = linear_residual_layernorm(ff, layer["w2"], layer["b2"],
                                      x, layer["ln2_g"], layer["ln2_b"])

    last_hidden = x.reshape(B, S, H)
    cls = last_hidden[:, 0, :]                                       # [B, H]

    logits = pooler_fc(cls, params["pool_w"], params["pool_b"],
                       params["fc_w"], params["fc_b"])               # [B, n_classes]
    return logits


# ---------------------------------------------------------------------------

if __name__ == "__main__":
    # small synthetic config consistent with the forward pass
    B, S = 2, 8
    HIDDEN, N_HEADS, N_LAYERS, FFN = 32, 4, 2, 64
    VOCAB, MAX_POS, TYPE_VOCAB = 64, 16, 2
    N_CLASSES = 3

    key = jax.random.PRNGKey(0)
    k_param, k_ids = jax.random.split(key)

    params = init_params(k_param, vocab=VOCAB, max_pos=MAX_POS,
                         type_vocab=TYPE_VOCAB, hidden=HIDDEN,
                         n_heads=N_HEADS, n_layers=N_LAYERS, ffn=FFN,
                         n_classes=N_CLASSES)

    input_ids = jax.random.randint(k_ids, (B, S), 0, VOCAB, dtype=jnp.int32)
    attention_mask = jnp.ones((B, S), dtype=jnp.int32).at[1, 6:].set(0)  # pad tail of seq 1

    logits = sentiment_classifier_forward(params, input_ids, attention_mask)
    jax.block_until_ready(logits)
    assert logits.shape == (B, N_CLASSES)
    print("KERNEL_OK")
</pallas_src>

<mosaic_0001>
module attributes {stable_mosaic.version = 11 : i64} {
  func.func @_ln_kernel(%arg0: i32, %arg1: memref<16x32xf32, #tpu.memory_space<vmem>>, %arg2: memref<1x32xf32, #tpu.memory_space<vmem>>, %arg3: memref<1x32xf32, #tpu.memory_space<vmem>>, %arg4: memref<16x32xbf16, #tpu.memory_space<vmem>>) attributes {dimension_semantics = [#tpu.dimension_semantics<parallel>], iteration_bounds = array<i64: 1>, scalar_prefetch = 0 : i64, scratch_operands = 0 : i64, tpu.core_type = #tpu.core_type<tc>, window_params = [{transform_indices = @transform_0, window_bounds = array<i64: 16, 32>}, {pipeline_mode = #tpu.pipeline_mode<synchronous>, transform_indices = @transform_1, window_bounds = array<i64: 1, 32>}, {pipeline_mode = #tpu.pipeline_mode<synchronous>, transform_indices = @transform_2, window_bounds = array<i64: 1, 32>}, {transform_indices = @transform_3, window_bounds = array<i64: 16, 32>}]} {
    %c0 = arith.constant 0 : index
    %c0_0 = arith.constant 0 : index
    %0 = vector.load %arg1[%c0, %c0_0] : memref<16x32xf32, #tpu.memory_space<vmem>>, vector<16x32xf32>
    %cst = arith.constant dense<0.000000e+00> : vector<16xf32>
    %1 = vector.multi_reduction <add>, %0, %cst [1] : vector<16x32xf32> to vector<16xf32>
    %2 = vector.shape_cast %1 : vector<16xf32> to vector<16x1xf32>
    %cst_1 = arith.constant 3.200000e+01 : f32
    %3 = vector.broadcast %cst_1 : f32 to vector<16x1xf32>
    %4 = arith.divf %2, %3 : vector<16x1xf32>
    %5 = vector.broadcast %4 : vector<16x1xf32> to vector<16x32xf32>
    %6 = arith.subf %0, %5 : vector<16x32xf32>
    %7 = arith.mulf %6, %6 : vector<16x32xf32>
    %cst_2 = arith.constant dense<0.000000e+00> : vector<16xf32>
    %8 = vector.multi_reduction <add>, %7, %cst_2 [1] : vector<16x32xf32> to vector<16xf32>
    %9 = vector.shape_cast %8 : vector<16xf32> to vector<16x1xf32>
    %cst_3 = arith.constant 3.200000e+01 : f32
    %10 = vector.broadcast %cst_3 : f32 to vector<16x1xf32>
    %11 = arith.divf %9, %10 : vector<16x1xf32>
    %12 = vector.broadcast %4 : vector<16x1xf32> to vector<16x32xf32>
    %13 = arith.subf %0, %12 : vector<16x32xf32>
    %cst_4 = arith.constant 9.99999996E-13 : f32
    %14 = vector.broadcast %cst_4 : f32 to vector<16x1xf32>
    %15 = arith.addf %11, %14 : vector<16x1xf32>
    %16 = math.rsqrt %15 : vector<16x1xf32>
    %17 = vector.broadcast %16 : vector<16x1xf32> to vector<16x32xf32>
    %18 = arith.mulf %13, %17 : vector<16x32xf32>
    %c0_5 = arith.constant 0 : index
    %c0_6 = arith.constant 0 : index
    %19 = vector.load %arg2[%c0_5, %c0_6] : memref<1x32xf32, #tpu.memory_space<vmem>>, vector<1x32xf32>
    %20 = vector.broadcast %19 : vector<1x32xf32> to vector<16x32xf32>
    %21 = arith.mulf %18, %20 : vector<16x32xf32>
    %c0_7 = arith.constant 0 : index
    %c0_8 = arith.constant 0 : index
    %22 = vector.load %arg3[%c0_7, %c0_8] : memref<1x32xf32, #tpu.memory_space<vmem>>, vector<1x32xf32>
    %23 = vector.broadcast %22 : vector<1x32xf32> to vector<16x32xf32>
    %24 = arith.addf %21, %23 : vector<16x32xf32>
    %25 = arith.truncf %24 : vector<16x32xf32> to vector<16x32xbf16>
    %c0_9 = arith.constant 0 : index
    %c0_10 = arith.constant 0 : index
    %26 = vector.load %arg4[%c0_9, %c0_10] : memref<16x32xbf16, #tpu.memory_space<vmem>>, vector<16x32xbf16>
    tpu.vector_store %arg4[%c0_9, %c0_10], %25 {strides = array<i32>} : memref<16x32xbf16, #tpu.memory_space<vmem>>, vector<16x32xbf16>,
    return
  }
  func.func @transform_0(%arg0: i32) -> (i32, i32) {
    %c0_i32 = arith.constant 0 : i32
    %c0_i32_0 = arith.constant 0 : i32
    return %arg0, %c0_i32 : i32, i32
  }
  func.func @transform_1(%arg0: i32) -> (i32, i32) {
    %c0_i32 = arith.constant 0 : i32
    %c0_i32_0 = arith.constant 0 : i32
    %c0_i32_1 = arith.constant 0 : i32
    return %c0_i32, %c0_i32_0 : i32, i32
  }
  func.func @transform_2(%arg0: i32) -> (i32, i32) {
    %c0_i32 = arith.constant 0 : i32
    %c0_i32_0 = arith.constant 0 : i32
    %c0_i32_1 = arith.constant 0 : i32
    return %c0_i32, %c0_i32_0 : i32, i32
  }
  func.func @transform_3(%arg0: i32) -> (i32, i32) {
    %c0_i32 = arith.constant 0 : i32
    %c0_i32_0 = arith.constant 0 : i32
    return %arg0, %c0_i32 : i32, i32
  }
}

</mosaic_0001>

<bundles_post_ra>
// kernel: tpu_custom_call.1
= control target key start
LH: loop header
LB: loop body
LE: loop exit
PB: predicated region body
PF: predicated region fallthrough
CT: control target
= control target key end

     0   :  { %8 = vsyncpa [#allocation3], 0  ;;  %s229_s0 = inlined_call_operand.hbm [shape: f32[16,32], index: 0, kind: input, shape index: {}]   ;;  %s230_s1 = inlined_call_operand.vmem [shape: f32[1,32], index: 1, kind: input, shape index: {}]   ;;  %s231_s2 = inlined_call_operand.vmem [shape: f32[1,32], index: 2, kind: input, shape index: {}]   ;;  %s232_s3 = inlined_call_operand.hbm [shape: bf16[16,32], index: 3, kind: output, shape index: {}]  }
   0x1   :  { %9 = vsyncpa [#allocation4], 0  ;;  %s169_s12 = smov [#allocation2]   ;;  %s121_s16 = scalar_lea.hbm %s229_s0, 256 }
   0x2   :  { %s15_s13 = sshll.u32 %s169_s12, 4  ;;  %p122_p0 = scmp.ne.s32.totalorder %s229_s0, %s121_s16  ;;  %s16_s13 = int_to_ptr.vmem [resolvable:$true] %s15_s13 }
   0x3   :  { %p125_p1 = scmp.lt.u32.totalorder %s121_s16, %s229_s0 }
   0x5   :  { %p127_p2 = pnand %p125_p1, %p122_p0 }
   0x7   :  { %130 = shalt.err (!%p127_p2)
}
   0x8   :  { %s131_s21 = scalar_lea.vmem %s16_s13, 256  ;;  %p136_p4 = scmp.lt.s32.totalorder %s16_s13, %s16_s13 }
   0x9   :  { %p132_p3 = scmp.ne.s32.totalorder %s16_s13, %s131_s21  ;;  %p137_p5 = scmp.lt.s32.totalorder %s131_s21, %s131_s21 }
   0xb   :  { %p138_p6 = por %p137_p5, %p136_p4 }
   0xd   :  { %p139_p7 = pnand %p138_p6, %p132_p3 }
   0xf   :  { %142 = shalt.err (!%p139_p7)
}
  0x10   :  { %s170_s22 = smov 128   ;;  %s171_s23 = smov 8  }
  0x11   :  { %21 = dma.hbm_to_vmem [thread:$0]  %s229_s0, 256, %s16_s13, [#allocation3], %s170_s22, %s170_s22, %s171_s23  }
  0x12   :  { %165 = dma.done.wait [#allocation3], 256  }
  0x13   :  { %166 = vsyncadd [#allocation3], 4294967040  ;;  %vm31_vm0 = vcmask 261120   ;;  %v29_v0 = vld [vmem:[#allocation2] sm:$0xff]  ;;  %v30_v1 = vld [vmem:[#allocation2 + $0x8] sm:$0xff]  ;;  %vm85_vm1 = vcmask 257024  }
  0x14   :  { %v32_v2 = vsel %vm31_vm0, %v29_v0, 0.0  ;;  %v35_v3 = vsel %vm31_vm0, %v30_v1, 0.0  ;;  %v105_v21 = vld [vmem:[%s230_s1] ss:$0 sm:$0xff]  ;;  %s172_s29 = smov [#allocation5]  }
  0x15   :  { %33 = vadd.xlane.f32.xlu0 %v32_v2  ;;  %v106_v23 = vld [vmem:[%s231_s2] ss:$0 sm:$0xff]  ;;  %s93_s30 = sshll.u32 %s172_s29, 4  ;;  %s94_s30 = int_to_ptr.vmem [resolvable:$true] %s93_s30 }
  0x16   :  { %s143_s1 = scalar_lea.vmem %s94_s30, 128  ;;  %p148_p9 = scmp.lt.s32.totalorder %s94_s30, %s94_s30 }
  0x17   :  { %p144_p8 = scmp.ne.s32.totalorder %s94_s30, %s143_s1  ;;  %p149_p10 = scmp.lt.s32.totalorder %s143_s1, %s143_s1 }
  0x19   :  { %36 = vadd.xlane.f32.xlu0 %v35_v3  ;;  %p150_p11 = por %p149_p10, %p148_p9 }
  0x1b   :  { %p151_p12 = pnand %p150_p11, %p144_p8 }
  0xa2   :  { %v34_v4 = vpop.xlane.xlu0 %33 }
  0xa3   :  { %v39_v5 = vmul.f32 0.03125, %v34_v4 }
  0xa5   :  { %v41_v6 = vsub.f32 %v29_v0, %v39_v5 }
  0xa6   :  { %v37_v7 = vpop.xlane.xlu0 %36 }
  0xa7   :  { %v40_v8 = vmul.f32 0.03125, %v37_v7  ;;  %v43_v9 = vmul.f32 %v41_v6, %v41_v6 }
  0xa9   :  { %v42_v10 = vsub.f32 %v30_v1, %v40_v8  ;;  %v45_v11 = vsel %vm31_vm0, %v43_v9, 0.0 }
  0xaa   :  { %46 = vadd.xlane.f32.xlu1 %v45_v11 }
  0xab   :  { %v44_v12 = vmul.f32 %v42_v10, %v42_v10 }
  0xad   :  { %v48_v13 = vsel %vm31_vm0, %v44_v12, 0.0 }
  0xae   :  { %49 = vadd.xlane.f32.xlu1 %v48_v13 }
 0x137   :  { %v47_v14 = vpop.xlane.xlu1 %46 }
 0x138   :  { %v51_v15 = vmul.f32 0.03125, %v47_v14 }
 0x13a   :  { %v53_v16 = vadd.f32 1e-12, %v51_v15 }
 0x13b   :  { %v50_v17 = vpop.xlane.xlu1 %49 }
 0x13c   :  { %117 = vrsqrt.f32 %v53_v16  ;;  %v52_v18 = vmul.f32 0.03125, %v50_v17 }
 0x13e   :  { %v54_v19 = vadd.f32 1e-12, %v52_v18 }
 0x140   :  { %119 = vrsqrt.f32 %v54_v19 }
 0x146   :  { %v118_v20 = vpop.eup %117 }
 0x147   :  { %v57_v22 = vmul.f32 %v118_v20, %v41_v6 }
 0x149   :  { %v66_v24 = vmul.f32 %v105_v21, %v57_v22 }
 0x14a   :  { %v120_v25 = vpop.eup %119 }
 0x14b   :  { %v58_v26 = vmul.f32 %v120_v25, %v42_v10  ;;  %v75_v27 = vadd.f32 %v106_v23, %v66_v24 }
 0x14d   :  { %v67_v28 = vmul.f32 %v105_v21, %v58_v26  ;;  %v109_v29 = vpack.c.bf16 %v75_v27, %v75_v27 }
 0x14f   :  { %v76_v30 = vadd.f32 %v106_v23, %v67_v28  ;;  %86 = vst.msk [vmem:[#allocation5] sm:$0xf] %vm85_vm1, %v109_v29 }
 0x151   :  { %v110_v31 = vpack.c.bf16 %v76_v30, %v76_v30 }
 0x153   :  { %87 = vst.msk [vmem:[#allocation5 + $0x4] sm:$0xf] %vm85_vm1, %v110_v31 }
 0x154   :  { %154 = shalt.err (!%p151_p12)
}
 0x155   :  { %s155_s5 = scalar_lea.hbm %s232_s3, 128 }
 0x156   :  { %p156_p13 = scmp.ne.s32.totalorder %s232_s3, %s155_s5  ;;  %p159_p0 = scmp.lt.u32.totalorder %s155_s5, %s232_s3 }
 0x158   :  { %p161_p1 = pnand %p159_p0, %p156_p13 }
 0x15a   :  { %164 = shalt.err (!%p161_p1)
}
 0x15b   :  { %s173_s10 = smov 64   ;;  %s174_s11 = smov 4  }
 0x15c   :  { %99 = dma.vmem_to_hbm [thread:$0]  %s94_s30, 128, %s232_s3, [#allocation4], %s173_s10, %s173_s10, %s174_s11  }
 0x15d   :  { %167 = dma.done.wait [#allocation4], 128  }
 0x15e   :  { %168 = vsyncadd [#allocation4], 4294967168 }
 0x15f   :  { %103 = vsyncpa [#allocation3], 1 }
 0x160   :  { %104 = vsyncpa [#allocation4], 1 }

</bundles_post_ra>
